<compile_context>
chip_gen: v5e
topology: v5e:2x2
jax: 0.10.0
libtpu: 0.0.40
codegen_flags: <defaults>
</compile_context>

<pallas_src>
import functools

import jax
import jax.numpy as jnp
from jax import lax
from jax.experimental import pallas as pl
from jax.experimental.pallas import tpu as pltpu


def _mixed_loss_kernel(w_ref, logit_ref, label_ref, wce_ref, err_ref, *,
                       num_classes, hw, tile_r, needs_mask):
    """Per-tile hot path: softmax stats, CE, class weight, Lovasz errors.

    Block shapes seen by the kernel:
      w_ref     : (C,)                f32 in SMEM
      logit_ref : (1, C, tile_r, 128) native dtype
      label_ref : (1, tile_r, 128)    i32
      wce_ref   : (1, 128)            f32   (per-lane partial CE sums)
      err_ref   : (C, 1, tile_r, 128) err dtype (|onehot - softmax|)
    """
    labels = label_ref[0]                                    # (tile_r, 128) i32

    # ---- running max / argmax over classes (pure VPU, first-max index) ----
    m = logit_ref[0, 0].astype(jnp.float32)
    amax = jnp.zeros(labels.shape, jnp.int32)
    for k in range(1, num_classes):
        x_k = logit_ref[0, k].astype(jnp.float32)
        gt = x_k > m
        m = jnp.where(gt, x_k, m)
        amax = jnp.where(gt, k, amax)

    # ---- softmax denominator, exp slabs, logit gathered at the label ----
    denom = jnp.zeros(labels.shape, jnp.float32)
    x_at_label = jnp.zeros(labels.shape, jnp.float32)
    exps = []
    for k in range(num_classes):
        x_k = logit_ref[0, k].astype(jnp.float32)
        e_k = jnp.exp(x_k - m)
        exps.append(e_k)
        denom = denom + e_k
        x_at_label = jnp.where(labels == k, x_k, x_at_label)

    inv_denom = pl.reciprocal(denom, approx=True)            # EUP vrcp
    log_denom = jnp.log(denom)

    # Per-pixel cross entropy: -(x[label] - m - log(denom)).
    # Padded pixels (sentinel label) pick x_at_label = 0 -> finite value, and
    # their class weight below is exactly 0, so their wce contribution is 0.
    ce = (m + log_denom) - x_at_label

    # class_weight = weights[max(argmax(logits), label)] via scalar selects
    # against the SMEM weight vector (no (C,T) one-hot, no XLU reduce).
    max_class = jnp.maximum(amax, labels)
    class_w = jnp.zeros(labels.shape, jnp.float32)
    for k in range(num_classes):
        class_w = jnp.where(max_class == k, w_ref[k], class_w)

    # Per-tile, per-lane partial sums of the weighted CE (lane-dense block).
    wce_ref[...] = jnp.sum(ce * class_w, axis=0, keepdims=True)

    # Lovasz per-class errors |onehot - softmax| (store-side cast to err dtype).
    for k in range(num_classes):
        fg_k = (labels == k).astype(jnp.float32)
        err_ref[k, 0] = jnp.abs(fg_k - exps[k] * inv_denom).astype(err_ref.dtype)

    if needs_mask:
        # Padding (if any) only ever lands in the LAST tile of each image, so
        # the full tiles pay nothing for the mask.
        @pl.when(pl.program_id(1) == pl.num_programs(1) - 1)
        def _mask_padding():
            pos = (pl.program_id(1) * (tile_r * 128)
                   + lax.broadcasted_iota(jnp.int32, (tile_r, 128), 0) * 128
                   + lax.broadcasted_iota(jnp.int32, (tile_r, 128), 1))
            validf = (pos < hw).astype(jnp.float32)
            for k in range(num_classes):
                err_ref[k, 0] = (err_ref[k, 0].astype(jnp.float32)
                                 * validf).astype(err_ref.dtype)


def _default_max_rows(num_classes, logit_bytes, err_bytes):
    # Target ~12 MiB of double-buffered blocks; cap at 256 rows (32768 px/tile).
    per_row = 128 * (num_classes * (logit_bytes + err_bytes) + 4)
    rows = (12 << 20) // (2 * per_row)
    return int(max(8, min(256, (rows // 8) * 8)))


def _choose_tiling(hw, max_rows):
    """Pick tile rows (of 128 px) minimizing padding; prefer exact divisors."""
    n_rows = pl.cdiv(hw, 128)
    if n_rows <= max_rows:
        return n_rows, 1                      # one full-extent tile per image
    tile_r = 0
    t = (max_rows // 8) * 8
    while t >= 8:                             # largest multiple-of-8 divisor
        if n_rows % t == 0:
            tile_r = t
            break
        t -= 8
    if tile_r < 64:                           # no decent divisor -> pad fallback
        tile_r = max(8, (max_rows // 8) * 8)
    return tile_r, pl.cdiv(n_rows, tile_r)


@functools.partial(jax.jit, static_argnames=("max_tile_rows", "err_dtype"))
def mixed_loss(predict, true, cwe_weights, *, max_tile_rows=None,
               err_dtype=jnp.bfloat16):
    """MixedLoss forward: CWE(predict, true) / 4 + LovaszSoftmax(predict, true).

    err_dtype=bf16 is a store-side pack of |onehot - softmax| only (no bf16
    arithmetic); it perturbs the Lovasz errors by ~2^-8 relative, which can
    slightly reorder the descending sort but is negligible for the loss value.
    pl.reciprocal(approx=True) adds ~2^-12 relative error to the softmax probs.
    """
    n, c, h, w = predict.shape
    hw = h * w

    logit_bytes = jnp.dtype(predict.dtype).itemsize
    err_bytes = jnp.dtype(err_dtype).itemsize
    if max_tile_rows is None:
        max_tile_rows = _default_max_rows(c, logit_bytes, err_bytes)

    tile_r, n_tiles = _choose_tiling(hw, max_tile_rows)
    rows_pad = n_tiles * tile_r
    hw_pad = rows_pad * 128
    needs_mask = hw_pad != hw

    # NCHW -> (N, C, HW) -> (N, C, rows, 128): contiguous reshapes only.
    # Logits stay in their native dtype (no f32 upcast copy in HBM).
    logits = predict.reshape(n, c, hw)
    labels = true.astype(jnp.int32).reshape(n, hw)
    if needs_mask:
        # TODO(synk): rare path (hw not a multiple of 128 and no usable row
        #             divisor); the pad is a full extra HBM copy of the logits.
        logits = jnp.pad(logits, ((0, 0), (0, 0), (0, hw_pad - hw)))
        labels = jnp.pad(labels, ((0, 0), (0, hw_pad - hw)), constant_values=c)
    logits = logits.reshape(n, c, rows_pad, 128)
    labels = labels.reshape(n, rows_pad, 128)
    weights = cwe_weights.astype(jnp.float32).reshape(c)

    kernel = functools.partial(_mixed_loss_kernel, num_classes=c, hw=hw,
                               tile_r=tile_r, needs_mask=needs_mask)

    wce_part, err = pl.pallas_call(
        kernel,
        out_shape=(
            jax.ShapeDtypeStruct((1, n * n_tiles * 128), jnp.float32),
            jax.ShapeDtypeStruct((c, n, rows_pad, 128), err_dtype),
        ),
        grid_spec=pltpu.PrefetchScalarGridSpec(
            num_scalar_prefetch=0,
            grid=(n, n_tiles),
            in_specs=[
                pl.BlockSpec(memory_space=pltpu.MemorySpace.SMEM),           # weights
                pl.BlockSpec((1, c, tile_r, 128), lambda b, i: (b, 0, i, 0)),  # logits
                pl.BlockSpec((1, tile_r, 128), lambda b, i: (b, i, 0)),        # labels
            ],
            out_specs=[
                pl.BlockSpec((1, 128), lambda b, i: (0, b * n_tiles + i)),     # CE partials
                pl.BlockSpec((c, 1, tile_r, 128), lambda b, i: (0, b, i, 0)),  # Lovasz errors
            ],
        ),
        compiler_params=pltpu.CompilerParams(
            dimension_semantics=("parallel", "parallel")),
    )(weights, logits, labels)

    # ---- CustomWeightedCrossEntropy: mean of weighted per-pixel CE ----
    # TODO(synk): normalization is sum(wce)/(N*H*W), matching the PyTorch
    #             module's (entropies * class_weights).mean().
    ce_loss = jnp.sum(wce_part) / (n * hw)

    # ---- LovaszSoftmax tail: one fused sort (err key, label payload) ----
    # Padded pixels have err == 0 and sentinel label (fg == 0 for every class),
    # which is exactly neutral for the descending sort / Jaccard / dot product.
    err_flat = err.reshape(c, n * hw_pad)
    labels_flat = jnp.broadcast_to(labels.reshape(1, n * hw_pad), (c, n * hw_pad))
    neg_err_sorted, labels_sorted = lax.sort(
        (-err_flat, labels_flat), dimension=1, num_keys=1)
    err_sorted = (-neg_err_sorted).astype(jnp.float32)
    class_ids = jnp.arange(c, dtype=jnp.int32)[:, None]
    fg_sorted = (labels_sorted == class_ids).astype(jnp.float32)
    gts = jnp.sum(fg_sorted, axis=1, keepdims=True)
    intersection = gts - jnp.cumsum(fg_sorted, axis=1)
    union = gts + jnp.cumsum(1.0 - fg_sorted, axis=1)
    jaccard = 1.0 - intersection / union
    grad = jnp.concatenate([jaccard[:, :1], jaccard[:, 1:] - jaccard[:, :-1]],
                           axis=1)
    per_class_loss = jnp.sum(err_sorted * grad, axis=1)
    present = gts[:, 0] > 0
    n_present = jnp.maximum(jnp.sum(present.astype(jnp.float32)), 1.0)
    lovasz = jnp.sum(jnp.where(present, per_class_loss, 0.0)) / n_present

    # TODO(synk): class_weight uses weights[max(argmax(predict), true)] exactly
    #             as the provided CustomWeightedCrossEntropy source specifies.
    return ce_loss / 4.0 + lovasz


if __name__ == "__main__":
    key = jax.random.PRNGKey(0)
    k_pred, k_true = jax.random.split(key)

    N, C, H, W = 2, 4, 16, 16
    predict = jax.random.normal(k_pred, (N, C, H, W), dtype=jnp.float32)
    true = jax.random.randint(k_true, (N, H, W), 0, C, dtype=jnp.int32)
    cwe_weights = jnp.array([1.0, 2.0, 3.0, 4.0], dtype=jnp.float32)

    loss = mixed_loss(predict, true, cwe_weights)
    jax.block_until_ready(loss)
    assert loss.shape == () and jnp.isfinite(loss)
    print("KERNEL_OK")
</pallas_src>

<mosaic_0001>
module attributes {stable_mosaic.version = 11 : i64} {
  func.func @_mixed_loss_kernel(%arg0: i32, %arg1: i32, %arg2: memref<4xf32, #tpu.memory_space<smem>>, %arg3: memref<1x4x2x128xf32, #tpu.memory_space<vmem>>, %arg4: memref<1x2x128xi32, #tpu.memory_space<vmem>>, %arg5: memref<1x128xf32, #tpu.memory_space<vmem>>, %arg6: memref<4x1x2x128xbf16, #tpu.memory_space<vmem>>) attributes {dimension_semantics = [#tpu.dimension_semantics<parallel>, #tpu.dimension_semantics<parallel>], iteration_bounds = array<i64: 2, 1>, scalar_prefetch = 0 : i64, scratch_operands = 0 : i64, tpu.core_type = #tpu.core_type<tc>, window_params = [{transform_indices = @transform_0, window_bounds = array<i64: 4>}, {transform_indices = @transform_1, window_bounds = array<i64: 1, 4, 2, 128>}, {transform_indices = @transform_2, window_bounds = array<i64: 1, 2, 128>}, {transform_indices = @transform_3, window_bounds = array<i64: 1, 128>}, {transform_indices = @transform_4, window_bounds = array<i64: 4, 1, 2, 128>}]} {
    %c0 = arith.constant 0 : index
    %c0_0 = arith.constant 0 : index
    %c0_1 = arith.constant 0 : index
    %0 = vector.load %arg4[%c0, %c0_0, %c0_1] : memref<1x2x128xi32, #tpu.memory_space<vmem>>, vector<1x2x128xi32>
    %1 = vector.shape_cast %0 : vector<1x2x128xi32> to vector<2x128xi32>
    %c0_2 = arith.constant 0 : index
    %c0_3 = arith.constant 0 : index
    %c0_4 = arith.constant 0 : index
    %c0_5 = arith.constant 0 : index
    %2 = vector.load %arg3[%c0_2, %c0_3, %c0_4, %c0_5] : memref<1x4x2x128xf32, #tpu.memory_space<vmem>>, vector<1x1x2x128xf32>
    %3 = vector.shape_cast %2 : vector<1x1x2x128xf32> to vector<2x128xf32>
    %c0_i32 = arith.constant 0 : i32
    %4 = vector.broadcast %c0_i32 : i32 to vector<2x128xi32>
    %c0_6 = arith.constant 0 : index
    %c1 = arith.constant 1 : index
    %c0_7 = arith.constant 0 : index
    %c0_8 = arith.constant 0 : index
    %5 = vector.load %arg3[%c0_6, %c1, %c0_7, %c0_8] : memref<1x4x2x128xf32, #tpu.memory_space<vmem>>, vector<1x1x2x128xf32>
    %6 = vector.shape_cast %5 : vector<1x1x2x128xf32> to vector<2x128xf32>
    %7 = arith.cmpf ogt, %6, %3 : vector<2x128xf32>
    %8 = arith.select %7, %6, %3 : vector<2x128xi1>, vector<2x128xf32>
    %c1_i32 = arith.constant 1 : i32
    %9 = vector.broadcast %c1_i32 : i32 to vector<2x128xi32>
    %10 = arith.select %7, %9, %4 : vector<2x128xi1>, vector<2x128xi32>
    %c0_9 = arith.constant 0 : index
    %c2 = arith.constant 2 : index
    %c0_10 = arith.constant 0 : index
    %c0_11 = arith.constant 0 : index
    %11 = vector.load %arg3[%c0_9, %c2, %c0_10, %c0_11] : memref<1x4x2x128xf32, #tpu.memory_space<vmem>>, vector<1x1x2x128xf32>
    %12 = vector.shape_cast %11 : vector<1x1x2x128xf32> to vector<2x128xf32>
    %13 = arith.cmpf ogt, %12, %8 : vector<2x128xf32>
    %14 = arith.select %13, %12, %8 : vector<2x128xi1>, vector<2x128xf32>
    %c2_i32 = arith.constant 2 : i32
    %15 = vector.broadcast %c2_i32 : i32 to vector<2x128xi32>
    %16 = arith.select %13, %15, %10 : vector<2x128xi1>, vector<2x128xi32>
    %c0_12 = arith.constant 0 : index
    %c3 = arith.constant 3 : index
    %c0_13 = arith.constant 0 : index
    %c0_14 = arith.constant 0 : index
    %17 = vector.load %arg3[%c0_12, %c3, %c0_13, %c0_14] : memref<1x4x2x128xf32, #tpu.memory_space<vmem>>, vector<1x1x2x128xf32>
    %18 = vector.shape_cast %17 : vector<1x1x2x128xf32> to vector<2x128xf32>
    %19 = arith.cmpf ogt, %18, %14 : vector<2x128xf32>
    %20 = arith.select %19, %18, %14 : vector<2x128xi1>, vector<2x128xf32>
    %c3_i32 = arith.constant 3 : i32
    %21 = vector.broadcast %c3_i32 : i32 to vector<2x128xi32>
    %22 = arith.select %19, %21, %16 : vector<2x128xi1>, vector<2x128xi32>
    %cst = arith.constant 0.000000e+00 : f32
    %23 = vector.broadcast %cst : f32 to vector<2x128xf32>
    %cst_15 = arith.constant 0.000000e+00 : f32
    %24 = vector.broadcast %cst_15 : f32 to vector<2x128xf32>
    %c0_16 = arith.constant 0 : index
    %c0_17 = arith.constant 0 : index
    %c0_18 = arith.constant 0 : index
    %c0_19 = arith.constant 0 : index
    %25 = vector.load %arg3[%c0_16, %c0_17, %c0_18, %c0_19] : memref<1x4x2x128xf32, #tpu.memory_space<vmem>>, vector<1x1x2x128xf32>
    %26 = vector.shape_cast %25 : vector<1x1x2x128xf32> to vector<2x128xf32>
    %27 = arith.subf %26, %20 : vector<2x128xf32>
    %28 = math.exp %27 : vector<2x128xf32>
    %29 = arith.addf %23, %28 : vector<2x128xf32>
    %c0_i32_20 = arith.constant 0 : i32
    %30 = vector.broadcast %c0_i32_20 : i32 to vector<2x128xi32>
    %31 = arith.cmpi eq, %1, %30 : vector<2x128xi32>
    %32 = arith.select %31, %26, %24 : vector<2x128xi1>, vector<2x128xf32>
    %c0_21 = arith.constant 0 : index
    %c1_22 = arith.constant 1 : index
    %c0_23 = arith.constant 0 : index
    %c0_24 = arith.constant 0 : index
    %33 = vector.load %arg3[%c0_21, %c1_22, %c0_23, %c0_24] : memref<1x4x2x128xf32, #tpu.memory_space<vmem>>, vector<1x1x2x128xf32>
    %34 = vector.shape_cast %33 : vector<1x1x2x128xf32> to vector<2x128xf32>
    %35 = arith.subf %34, %20 : vector<2x128xf32>
    %36 = math.exp %35 : vector<2x128xf32>
    %37 = arith.addf %29, %36 : vector<2x128xf32>
    %c1_i32_25 = arith.constant 1 : i32
    %38 = vector.broadcast %c1_i32_25 : i32 to vector<2x128xi32>
    %39 = arith.cmpi eq, %1, %38 : vector<2x128xi32>
    %40 = arith.select %39, %34, %32 : vector<2x128xi1>, vector<2x128xf32>
    %c0_26 = arith.constant 0 : index
    %c2_27 = arith.constant 2 : index
    %c0_28 = arith.constant 0 : index
    %c0_29 = arith.constant 0 : index
    %41 = vector.load %arg3[%c0_26, %c2_27, %c0_28, %c0_29] : memref<1x4x2x128xf32, #tpu.memory_space<vmem>>, vector<1x1x2x128xf32>
    %42 = vector.shape_cast %41 : vector<1x1x2x128xf32> to vector<2x128xf32>
    %43 = arith.subf %42, %20 : vector<2x128xf32>
    %44 = math.exp %43 : vector<2x128xf32>
    %45 = arith.addf %37, %44 : vector<2x128xf32>
    %c2_i32_30 = arith.constant 2 : i32
    %46 = vector.broadcast %c2_i32_30 : i32 to vector<2x128xi32>
    %47 = arith.cmpi eq, %1, %46 : vector<2x128xi32>
    %48 = arith.select %47, %42, %40 : vector<2x128xi1>, vector<2x128xf32>
    %c0_31 = arith.constant 0 : index
    %c3_32 = arith.constant 3 : index
    %c0_33 = arith.constant 0 : index
    %c0_34 = arith.constant 0 : index
    %49 = vector.load %arg3[%c0_31, %c3_32, %c0_33, %c0_34] : memref<1x4x2x128xf32, #tpu.memory_space<vmem>>, vector<1x1x2x128xf32>
    %50 = vector.shape_cast %49 : vector<1x1x2x128xf32> to vector<2x128xf32>
    %51 = arith.subf %50, %20 : vector<2x128xf32>
    %52 = math.exp %51 : vector<2x128xf32>
    %53 = arith.addf %45, %52 : vector<2x128xf32>
    %c3_i32_35 = arith.constant 3 : i32
    %54 = vector.broadcast %c3_i32_35 : i32 to vector<2x128xi32>
    %55 = arith.cmpi eq, %1, %54 : vector<2x128xi32>
    %56 = arith.select %55, %50, %48 : vector<2x128xi1>, vector<2x128xf32>
    %57 = tpu.reciprocal %53 {approx = true} : vector<2x128xf32> -> vector<2x128xf32>
    %58 = math.log %53 : vector<2x128xf32>
    %59 = arith.addf %20, %58 : vector<2x128xf32>
    %60 = arith.subf %59, %56 : vector<2x128xf32>
    %61 = arith.maxsi %22, %1 : vector<2x128xi32>
    %cst_36 = arith.constant 0.000000e+00 : f32
    %62 = vector.broadcast %cst_36 : f32 to vector<2x128xf32>
    %c0_i32_37 = arith.constant 0 : i32
    %63 = vector.broadcast %c0_i32_37 : i32 to vector<2x128xi32>
    %64 = arith.cmpi eq, %61, %63 : vector<2x128xi32>
    %c0_38 = arith.constant 0 : index
    %65 = memref.load %arg2[%c0_38] : memref<4xf32, #tpu.memory_space<smem>>
    %66 = vector.broadcast %65 : f32 to vector<2x128xf32>
    %67 = arith.select %64, %66, %62 : vector<2x128xi1>, vector<2x128xf32>
    %c1_i32_39 = arith.constant 1 : i32
    %68 = vector.broadcast %c1_i32_39 : i32 to vector<2x128xi32>
    %69 = arith.cmpi eq, %61, %68 : vector<2x128xi32>
    %c1_40 = arith.constant 1 : index
    %70 = memref.load %arg2[%c1_40] : memref<4xf32, #tpu.memory_space<smem>>
    %71 = vector.broadcast %70 : f32 to vector<2x128xf32>
    %72 = arith.select %69, %71, %67 : vector<2x128xi1>, vector<2x128xf32>
    %c2_i32_41 = arith.constant 2 : i32
    %73 = vector.broadcast %c2_i32_41 : i32 to vector<2x128xi32>
    %74 = arith.cmpi eq, %61, %73 : vector<2x128xi32>
    %c2_42 = arith.constant 2 : index
    %75 = memref.load %arg2[%c2_42] : memref<4xf32, #tpu.memory_space<smem>>
    %76 = vector.broadcast %75 : f32 to vector<2x128xf32>
    %77 = arith.select %74, %76, %72 : vector<2x128xi1>, vector<2x128xf32>
    %c3_i32_43 = arith.constant 3 : i32
    %78 = vector.broadcast %c3_i32_43 : i32 to vector<2x128xi32>
    %79 = arith.cmpi eq, %61, %78 : vector<2x128xi32>
    %c3_44 = arith.constant 3 : index
    %80 = memref.load %arg2[%c3_44] : memref<4xf32, #tpu.memory_space<smem>>
    %81 = vector.broadcast %80 : f32 to vector<2x128xf32>
    %82 = arith.select %79, %81, %77 : vector<2x128xi1>, vector<2x128xf32>
    %83 = arith.mulf %60, %82 : vector<2x128xf32>
    %cst_45 = arith.constant dense<0.000000e+00> : vector<128xf32>
    %84 = vector.multi_reduction <add>, %83, %cst_45 [0] : vector<2x128xf32> to vector<128xf32>
    %85 = vector.shape_cast %84 : vector<128xf32> to vector<1x128xf32>
    %c0_46 = arith.constant 0 : index
    %c0_47 = arith.constant 0 : index
    %86 = vector.load %arg5[%c0_46, %c0_47] : memref<1x128xf32, #tpu.memory_space<vmem>>, vector<1x128xf32>
    tpu.vector_store %arg5[%c0_46, %c0_47], %85 {strides = array<i32>} : memref<1x128xf32, #tpu.memory_space<vmem>>, vector<1x128xf32>,
    %c0_i32_48 = arith.constant 0 : i32
    %87 = vector.broadcast %c0_i32_48 : i32 to vector<2x128xi32>
    %88 = arith.cmpi eq, %1, %87 : vector<2x128xi32>
    %89 = arith.extui %88 : vector<2x128xi1> to vector<2x128xi32>
    %90 = arith.sitofp %89 : vector<2x128xi32> to vector<2x128xf32>
    %91 = arith.mulf %28, %57 : vector<2x128xf32>
    %92 = arith.subf %90, %91 : vector<2x128xf32>
    %93 = math.absf %92 : vector<2x128xf32>
    %94 = arith.truncf %93 : vector<2x128xf32> to vector<2x128xbf16>
    %c0_49 = arith.constant 0 : index
    %c0_50 = arith.constant 0 : index
    %c0_51 = arith.constant 0 : index
    %c0_52 = arith.constant 0 : index
    %95 = vector.load %arg6[%c0_49, %c0_50, %c0_51, %c0_52] : memref<4x1x2x128xbf16, #tpu.memory_space<vmem>>, vector<1x1x2x128xbf16>
    %96 = vector.shape_cast %95 : vector<1x1x2x128xbf16> to vector<2x128xbf16>
    %97 = vector.shape_cast %94 : vector<2x128xbf16> to vector<1x1x2x128xbf16>
    tpu.vector_store %arg6[%c0_49, %c0_50, %c0_51, %c0_52], %97 {strides = array<i32>} : memref<4x1x2x128xbf16, #tpu.memory_space<vmem>>, vector<1x1x2x128xbf16>,
    %c1_i32_53 = arith.constant 1 : i32
    %98 = vector.broadcast %c1_i32_53 : i32 to vector<2x128xi32>
    %99 = arith.cmpi eq, %1, %98 : vector<2x128xi32>
    %100 = arith.extui %99 : vector<2x128xi1> to vector<2x128xi32>
    %101 = arith.sitofp %100 : vector<2x128xi32> to vector<2x128xf32>
    %102 = arith.mulf %36, %57 : vector<2x128xf32>
    %103 = arith.subf %101, %102 : vector<2x128xf32>
    %104 = math.absf %103 : vector<2x128xf32>
    %105 = arith.truncf %104 : vector<2x128xf32> to vector<2x128xbf16>
    %c1_54 = arith.constant 1 : index
    %c0_55 = arith.constant 0 : index
    %c0_56 = arith.constant 0 : index
    %c0_57 = arith.constant 0 : index
    %106 = vector.load %arg6[%c1_54, %c0_55, %c0_56, %c0_57] : memref<4x1x2x128xbf16, #tpu.memory_space<vmem>>, vector<1x1x2x128xbf16>
    %107 = vector.shape_cast %106 : vector<1x1x2x128xbf16> to vector<2x128xbf16>
    %108 = vector.shape_cast %105 : vector<2x128xbf16> to vector<1x1x2x128xbf16>
    tpu.vector_store %arg6[%c1_54, %c0_55, %c0_56, %c0_57], %108 {strides = array<i32>} : memref<4x1x2x128xbf16, #tpu.memory_space<vmem>>, vector<1x1x2x128xbf16>,
    %c2_i32_58 = arith.constant 2 : i32
    %109 = vector.broadcast %c2_i32_58 : i32 to vector<2x128xi32>
    %110 = arith.cmpi eq, %1, %109 : vector<2x128xi32>
    %111 = arith.extui %110 : vector<2x128xi1> to vector<2x128xi32>
    %112 = arith.sitofp %111 : vector<2x128xi32> to vector<2x128xf32>
    %113 = arith.mulf %44, %57 : vector<2x128xf32>
    %114 = arith.subf %112, %113 : vector<2x128xf32>
    %115 = math.absf %114 : vector<2x128xf32>
    %116 = arith.truncf %115 : vector<2x128xf32> to vector<2x128xbf16>
    %c2_59 = arith.constant 2 : index
    %c0_60 = arith.constant 0 : index
    %c0_61 = arith.constant 0 : index
    %c0_62 = arith.constant 0 : index
    %117 = vector.load %arg6[%c2_59, %c0_60, %c0_61, %c0_62] : memref<4x1x2x128xbf16, #tpu.memory_space<vmem>>, vector<1x1x2x128xbf16>
    %118 = vector.shape_cast %117 : vector<1x1x2x128xbf16> to vector<2x128xbf16>
    %119 = vector.shape_cast %116 : vector<2x128xbf16> to vector<1x1x2x128xbf16>
    tpu.vector_store %arg6[%c2_59, %c0_60, %c0_61, %c0_62], %119 {strides = array<i32>} : memref<4x1x2x128xbf16, #tpu.memory_space<vmem>>, vector<1x1x2x128xbf16>,
    %c3_i32_63 = arith.constant 3 : i32
    %120 = vector.broadcast %c3_i32_63 : i32 to vector<2x128xi32>
    %121 = arith.cmpi eq, %1, %120 : vector<2x128xi32>
    %122 = arith.extui %121 : vector<2x128xi1> to vector<2x128xi32>
    %123 = arith.sitofp %122 : vector<2x128xi32> to vector<2x128xf32>
    %124 = arith.mulf %52, %57 : vector<2x128xf32>
    %125 = arith.subf %123, %124 : vector<2x128xf32>
    %126 = math.absf %125 : vector<2x128xf32>
    %127 = arith.truncf %126 : vector<2x128xf32> to vector<2x128xbf16>
    %c3_64 = arith.constant 3 : index
    %c0_65 = arith.constant 0 : index
    %c0_66 = arith.constant 0 : index
    %c0_67 = arith.constant 0 : index
    %128 = vector.load %arg6[%c3_64, %c0_65, %c0_66, %c0_67] : memref<4x1x2x128xbf16, #tpu.memory_space<vmem>>, vector<1x1x2x128xbf16>
    %129 = vector.shape_cast %128 : vector<1x1x2x128xbf16> to vector<2x128xbf16>
    %130 = vector.shape_cast %127 : vector<2x128xbf16> to vector<1x1x2x128xbf16>
    tpu.vector_store %arg6[%c3_64, %c0_65, %c0_66, %c0_67], %130 {strides = array<i32>} : memref<4x1x2x128xbf16, #tpu.memory_space<vmem>>, vector<1x1x2x128xbf16>,
    return
  }
  func.func @transform_0(%arg0: i32, %arg1: i32) -> i32 {
    %c0_i32 = arith.constant 0 : i32
    %c0_i32_0 = arith.constant 0 : i32
    return %c0_i32 : i32
  }
  func.func @transform_1(%arg0: i32, %arg1: i32) -> (i32, i32, i32, i32) {
    %c0_i32 = arith.constant 0 : i32
    %c0_i32_0 = arith.constant 0 : i32
    %c0_i32_1 = arith.constant 0 : i32
    return %arg0, %c0_i32, %arg1, %c0_i32_0 : i32, i32, i32, i32
  }
  func.func @transform_2(%arg0: i32, %arg1: i32) -> (i32, i32, i32) {
    %c0_i32 = arith.constant 0 : i32
    %c0_i32_0 = arith.constant 0 : i32
    return %arg0, %arg1, %c0_i32 : i32, i32, i32
  }
  func.func @transform_3(%arg0: i32, %arg1: i32) -> (i32, i32) {
    %c1_i32 = arith.constant 1 : i32
    %0 = arith.muli %arg0, %c1_i32 : i32
    %1 = arith.addi %0, %arg1 : i32
    %c0_i32 = arith.constant 0 : i32
    %c0_i32_0 = arith.constant 0 : i32
    return %c0_i32, %1 : i32, i32
  }
  func.func @transform_4(%arg0: i32, %arg1: i32) -> (i32, i32, i32, i32) {
    %c0_i32 = arith.constant 0 : i32
    %c0_i32_0 = arith.constant 0 : i32
    %c0_i32_1 = arith.constant 0 : i32
    return %c0_i32, %arg0, %arg1, %c0_i32_0 : i32, i32, i32, i32
  }
}

</mosaic_0001>

<bundles_post_ra>
// kernel: neg.0
= control target key start
LH: loop header
LB: loop body
LE: loop exit
PB: predicated region body
PF: predicated region fallthrough
CT: control target
= control target key end

     0   :  { %s184_s0 = inlined_call_operand.vmem [shape: bf16[4,2,2,128], index: 0, kind: input, shape index: {}]   ;;  %s185_s1 = inlined_call_operand.vmem [shape: bf16[4,2,2,128], index: 1, kind: output, shape index: {}]  }
   0x1   :  { %v5_v0 = vld [vmem:[%s184_s0] sm:$0x1]  ;;  %v112_v1 = vld [vmem:[%s184_s0 + $0x2] sm:$0x1]  ;;  %v114_v2 = vld [vmem:[%s184_s0 + $0x4] sm:$0x1] }
   0x2   :  { %v6_v3 = vunpack.c.l.bf16 %v5_v0  ;;  %v19_v4 = vunpack.c.l.bf16 %v112_v1  ;;  %v33_v5 = vunpack.c.l.bf16 %v114_v2  ;;  %v116_v6 = vld [vmem:[%s184_s0 + $0x6] sm:$0x1]  ;;  %v118_v7 = vld [vmem:[%s184_s0 + $0x1] sm:$0x1]  ;;  %v120_v8 = vld [vmem:[%s184_s0 + $0x3] sm:$0x1] }
   0x3   :  { %v47_v9 = vunpack.c.l.bf16 %v116_v6  ;;  %v61_v10 = vunpack.c.l.bf16 %v118_v7  ;;  %v75_v11 = vunpack.c.l.bf16 %v120_v8  ;;  %v122_v12 = vld [vmem:[%s184_s0 + $0x5] sm:$0x1]  ;;  %v124_v13 = vld [vmem:[%s184_s0 + $0x7] sm:$0x1] }
   0x4   :  { %v10_v14 = vxor.u32 2147483648, %v6_v3  ;;  %v23_v15 = vxor.u32 2147483648, %v19_v4  ;;  %v37_v16 = vxor.u32 2147483648, %v33_v5  ;;  %v89_v17 = vunpack.c.l.bf16 %v122_v12 }
   0x5   :  { %v51_v18 = vxor.u32 2147483648, %v47_v9  ;;  %v65_v19 = vxor.u32 2147483648, %v61_v10  ;;  %v79_v20 = vxor.u32 2147483648, %v75_v11  ;;  %v103_v21 = vunpack.c.l.bf16 %v124_v13 }
   0x6   :  { %v12_v22 = vpack.c.bf16 0.0, %v10_v14  ;;  %v26_v23 = vpack.c.bf16 0.0, %v23_v15  ;;  %v40_v24 = vpack.c.bf16 0.0, %v37_v16  ;;  %v93_v25 = vxor.u32 2147483648, %v89_v17 }
   0x7   :  { %v54_v26 = vpack.c.bf16 0.0, %v51_v18  ;;  %v107_v27 = vxor.u32 2147483648, %v103_v21  ;;  %v68_v28 = vpack.c.bf16 0.0, %v65_v19  ;;  %v82_v29 = vpack.c.bf16 0.0, %v79_v20 }
   0x8   :  { %13 = vst [vmem:[%s185_s1] sm:$0x1] %v12_v22  ;;  %v96_v30 = vpack.c.bf16 0.0, %v93_v25 }
   0x9   :  { %113 = vst [vmem:[%s185_s1 + $0x2] sm:$0x1] %v26_v23  ;;  %v110_v31 = vpack.c.bf16 0.0, %v107_v27 }
   0xa   :  { %115 = vst [vmem:[%s185_s1 + $0x4] sm:$0x1] %v40_v24 }
   0xb   :  { %117 = vst [vmem:[%s185_s1 + $0x6] sm:$0x1] %v54_v26 }
   0xc   :  { %119 = vst [vmem:[%s185_s1 + $0x1] sm:$0x1] %v68_v28 }
   0xd   :  { %121 = vst [vmem:[%s185_s1 + $0x3] sm:$0x1] %v82_v29 }
   0xe   :  { %123 = vst [vmem:[%s185_s1 + $0x5] sm:$0x1] %v96_v30 }
   0xf   :  { %125 = vst [vmem:[%s185_s1 + $0x7] sm:$0x1] %v110_v31 }

// kernel: mixed_loss.1
= control target key start
LH: loop header
LB: loop body
LE: loop exit
PB: predicated region body
PF: predicated region fallthrough
CT: control target
= control target key end

     0   :  { %10 = vsyncpa [#allocation3], 0  ;;  %s732_s15 = smov 0   ;;  %s734_s16 = smov 0   ;;  %s841_s0 = inlined_call_operand.vmem [shape: f32[4], index: 0, kind: input, shape index: {}]   ;;  %s842_s1 = inlined_call_operand.vmem [shape: f32[2,4,2,128], index: 1, kind: input, shape index: {}]   ;;  %s843_s2 = inlined_call_operand.vmem [shape: s32[2,2,128], index: 2, kind: input, shape index: {}]   ;;  %s844_s3 = inlined_call_operand.vmem [shape: f32[1,256], index: 3, kind: output, shape index: {0}]   ;;  %s845_s4 = inlined_call_operand.vmem [shape: bf16[4,2,2,128], index: 4, kind: output, shape index: {1}]  }
   0x1   :  { %s736_s17 = smov 0   ;;  %s738_s18 = smov 0  }
   0x2   :  { %s740_s19 = smov 0  }
   0x3 LB: > { %s552_s20 = sadd.s32 4294967295, %s702_s19   ;;  %s28_s21 = sadd.s32 1, %s698_s18  ;;  %s702_s19 = sphi %s740_s19, %s16_s19   ;;  %s698_s18 = sphi %s738_s18, %s850_s18   ;;  %s694_s17 = sphi %s736_s17, %s849_s17   ;;  %s690_s16 = sphi %s734_s16, %s848_s16   ;;  %s686_s15 = sphi %s732_s15, %s847_s15  }
   0x4   : > { %p30_p0 = scmp.ge.s32.totalorder %s28_s21, 2  ;;  %s142_s22 = sadd.s32 1, %s690_s16 }
   0x5   : > { %p152_p1 = scmp.ne.s32.totalorder %s690_s16, %s686_s15  ;;  %p153_p2 = scmp.eq.s32.totalorder %s552_s20, 1 }
   0x6   : > { %s852_s21 = smov (%p30_p0, %s28_s21), 0  ;;  %p554_p4 = scmp.ge.s32.totalorder %s702_s19, 1 }
   0x7   : > { %p764_p3 = por %p153_p2, %p152_p1  ;;  %s137_s24 = ssub.s32 %s698_s18, %s852_s21 }
   0x8   : > { %p166_p5 = scmp.lt.s32.totalorder %s702_s19, 3  ;;  %p140_p6 = scmp.eq.s32.totalorder %s137_s24, 0 }
   0x9   : > { %p588_p8 = scmp.eq.s32.totalorder %s552_s20, 0  ;;  %s178_s28 = sshll.u32 %s841_s0, 4  ;;  %s179_s28 = int_to_ptr.vmem [resolvable:$true] %s178_s28 }
   0xa   : > { %p167_p7 = pnand %p554_p4, %p166_p5  ;;  %s704_s29 = smov [#allocation2]  }
   0xb   : > { %s773_s25 = scalar_select %p140_p6, %s690_s16, %s142_s22  }
   0xc   : > { %p584_p9 = pneg %p167_p7  ;;  %212 = sbr.rel (%p167_p7) target bundleno = 81 (0x51), region = 32 }
   0xe   : > { %p585_p10 = pnand %p588_p8, %p584_p9 }
  0x10   : > { %587 = dma.vmem_to_smem (!%p585_p10), %s179_s28, 16, %s704_s29, [#allocation3]  }
  0x11   : > { %681 = dma.done.wait (%p588_p8), [#allocation3], 16  }
  0x12   : > { %683 = vsyncadd (%p588_p8), [#allocation3], 4294967280 }
  0x13   : > { %219 = sfence }
  0x14   : > { %p253_p11 = scmp.lt.s32.totalorder %s694_s17, 1  ;;  %v705_v11 = vmov 0   ;;  %s322_s13 = sld [smem:[#allocation2]]  ;;  %v706_v38 = vmov 0.0   ;;  %vm338_vm12 = vcmask 1041408  }
  0x15   : > { %s566_s14 = sld [smem:[#allocation2 + $0x1]]  ;;  %s250_s24 = sand.u32 1, %s686_s15  }
  0x16   : > { %s780_s30 = scalar_select %p253_p11, %s694_s17, 1 }
  0x17   : > { %s801_s20 = sld [smem:[#allocation2 + $0x2]]  ;;  %s559_s26 = sshll.u32 %s250_s24, 2 }
  0x18   : > { %s579_s5 = sshll.u32 %s780_s30, 3  ;;  %s562_s9 = sshll.u32 %s780_s30, 1 }
  0x19   : > { %s260_s8 = scalar_lea.vmem %s842_s1, %s579_s5  ;;  %s267_s12 = scalar_lea.vmem %s843_s2, %s562_s9 }
  0x1a   : > { %v274_v0 = vld [vmem:[%s260_s8] sm:$0x3]  ;;  %v563_v1 = vld [vmem:[%s260_s8 + $0x2] sm:$0x3]  ;;  %v564_v2 = vld [vmem:[%s260_s8 + $0x4] sm:$0x3]  ;;  %v323_v30 = vstv %s322_s13  ;;  %s271_s29 = scalar_lea.vmem %s844_s3, %s780_s30  ;;  %s394_s7 = scalar_lea.vmem (%p764_p3), %s845_s4, %s694_s17 }
  0x1b   : > { %vm277_vm0 = vcmp.gt.f32.partialorder %v563_v1, %v274_v0  ;;  %v565_v4 = vld [vmem:[%s260_s8 + $0x6] sm:$0x3]  ;;  %v273_v18 = vld [vmem:[%s267_s12] sm:$0x3]  ;;  %s804_s22 = sld [smem:[#allocation2 + $0x3]]  ;;  %v327_v33 = vstv %s566_s14  ;;  %s252_s15 = scalar_lea.vmem [#allocation4], %s559_s26 }
  0x1c   : > { %v278_v3 = vsel %vm277_vm0, %v563_v1, %v274_v0  ;;  %v279_v12 = vsel %vm277_vm0, 1, %v705_v11  ;;  %vm294_vm3 = vcmp.eq.s32.totalorder %v273_v18, 0  ;;  %vm300_vm5 = vcmp.eq.s32.totalorder %v273_v18, 1 }
  0x1d   : > { %vm282_vm1 = vcmp.gt.f32.partialorder %v564_v2, %v278_v3  ;;  %v295_v25 = vsel %vm294_vm3, %v274_v0, 0.0  ;;  %vm306_vm6 = vcmp.eq.s32.totalorder %v273_v18, 2  ;;  %vm312_vm8 = vcmp.eq.s32.totalorder %v273_v18, 3 }
  0x1e   : > { %v283_v5 = vsel %vm282_vm1, %v564_v2, %v278_v3  ;;  %v284_v17 = vsel %vm282_vm1, 2, %v279_v12  ;;  %v301_v29 = vsel %vm300_vm5, %v563_v1, %v295_v25  ;;  %v331_v36 = vstv %s801_s20 }
  0x1f   : > { %vm287_vm2 = vcmp.gt.f32.partialorder %v565_v4, %v283_v5  ;;  %v307_v31 = vsel %vm306_vm6, %v564_v2, %v301_v29  ;;  %v569_v39 = vsel %vm294_vm3, 1.0, %v706_v38  ;;  %v570_v40 = vsel %vm300_vm5, 1.0, %v706_v38 }
  0x20   : > { %v788_v6 = vsel %vm287_vm2, %v565_v4, %v283_v5  ;;  %v289_v19 = vsel %vm287_vm2, 3, %v284_v17  ;;  %v313_v34 = vsel %vm312_vm8, %v565_v4, %v307_v31  ;;  %v572_v41 = vsel %vm306_vm6, 1.0, %v706_v38 }
  0x21   : > { %v290_v7 = vsub.f32 %v274_v0, %v788_v6  ;;  %v296_v8 = vsub.f32 %v563_v1, %v788_v6  ;;  %v302_v9 = vsub.f32 %v564_v2, %v788_v6  ;;  %v308_v10 = vsub.f32 %v565_v4, %v788_v6 }
  0x22   : > { %vm319_vm4 = vcmp.gt.s32.totalorder %v289_v19, %v273_v18  ;;  %v574_v42 = vsel %vm312_vm8, 1.0, %v706_v38  ;;  %v335_v50 = vstv %s804_s22 }
  0x23   : > { %v291_v13 = vmul.f32 1.442695, %v290_v7  ;;  %v297_v14 = vmul.f32 1.442695, %v296_v8  ;;  %v303_v15 = vmul.f32 1.442695, %v302_v9  ;;  %v320_v27 = vsel %vm319_vm4, %v289_v19, %v273_v18 }
  0x24   : > { %v309_v16 = vmul.f32 1.442695, %v308_v10  ;;  %vm321_vm7 = vcmp.eq.s32.totalorder %v320_v27, 0  ;;  %vm325_vm9 = vcmp.eq.s32.totalorder %v320_v27, 1  ;;  %vm329_vm10 = vcmp.eq.s32.totalorder %v320_v27, 2 }
  0x25   : > { %633 = vpow2.f32 %v291_v13  ;;  %v324_v32 = vsel %vm321_vm7, %v323_v30, 0.0  ;;  %vm333_vm11 = vcmp.eq.s32.totalorder %v320_v27, 3 }
  0x26   : > { %635 = vpow2.f32 %v297_v14  ;;  %v328_v35 = vsel %vm325_vm9, %v327_v33, %v324_v32 }
  0x27   : > { %637 = vpow2.f32 %v303_v15  ;;  %v332_v49 = vsel %vm329_vm10, %v331_v36, %v328_v35 }
  0x28   : > { %639 = vpow2.f32 %v309_v16  ;;  %v336_v56 = vsel %vm333_vm11, %v335_v50, %v332_v49 }
  0x2b   : > { %v634_v20 = vpop.eup %633 }
  0x2c   : > { %v636_v21 = vpop.eup %635 }
  0x2d   : > { %v638_v22 = vpop.eup %637  ;;  %v299_v23 = vadd.f32 %v636_v21, %v634_v20 }
  0x2e   : > { %v640_v24 = vpop.eup %639 }
  0x2f   : > { %v305_v26 = vadd.f32 %v638_v22, %v299_v23 }
  0x31   : > { %v311_v28 = vadd.f32 %v640_v24, %v305_v26 }
  0x33   : > { %641 = vrcp.f32 %v311_v28 }
  0x34   : > { %643 = vlog2.f32 %v311_v28 }
  0x39   : > { %v642_v37 = vpop.eup %641 }
  0x3a   : > { %v644_v43 = vpop.eup %643  ;;  %v349_v44 = vmul.f32 %v642_v37, %v634_v20  ;;  %v356_v45 = vmul.f32 %v642_v37, %v636_v21  ;;  %v364_v46 = vmul.f32 %v642_v37, %v638_v22  ;;  %v372_v47 = vmul.f32 %v642_v37, %v640_v24 }
  0x3b   : > { %v316_v48 = vmul.f32 0.6931472, %v644_v43 }
  0x3c   : > { %v350_v51 = vsub.f32 %v569_v39, %v349_v44  ;;  %v357_v52 = vsub.f32 %v570_v40, %v356_v45  ;;  %v365_v53 = vsub.f32 %v572_v41, %v364_v46  ;;  %v373_v54 = vsub.f32 %v574_v42, %v372_v47 }
  0x3d   : > { %v317_v55 = vadd.f32 %v316_v48, %v788_v6 }
  0x3e   : > { %v351_v57 = vand.u32 2147483647, %v350_v51  ;;  %v358_v58 = vand.u32 2147483647, %v357_v52  ;;  %v366_v59 = vand.u32 2147483647, %v365_v53 }
  0x3f   : > { %v318_v60 = vsub.f32 %v317_v55, %v313_v34  ;;  %v374_v61 = vand.u32 2147483647, %v373_v54 }
  0x40   : > { %v352_v62 = vpack.c.bf16 %v351_v57, %v351_v57  ;;  %v359_v63 = vpack.c.bf16 %v358_v58, %v358_v58  ;;  %v367_v0 = vpack.c.bf16 %v366_v59, %v366_v59 }
  0x41   : > { %v337_v1 = vmul.f32 %v336_v56, %v318_v60  ;;  %v375_v2 = vpack.c.bf16 %v374_v61, %v374_v61 }
  0x42   : > { %353 = vst [vmem:[%s252_s15] sm:$0x1] %v352_v62 }
  0x43   : > { %v339_v3 = vsel %vm338_vm12, %v337_v1, 0.0  ;;  %571 = vst [vmem:[%s252_s15 + $0x1] sm:$0x1] %v359_v63 }
  0x44   : > { %v340_v4 = vrot.slane %v339_v3, 4  ;;  %573 = vst [vmem:[%s252_s15 + $0x2] sm:$0x1] %v367_v0 }
  0x45   : > { %575 = vst [vmem:[%s252_s15 + $0x3] sm:$0x1] %v375_v2 }
  0x46   : > { %v341_v5 = vadd.f32 %v340_v4, %v339_v3 }
  0x48   : > { %v342_v6 = vrot.slane %v341_v5, 2 }
  0x49   : > { %v411_v10 = vld [vmem:[%s252_s15] sm:$0x1] (%p764_p3) }
  0x4a   : > { %v343_v7 = vadd.f32 %v342_v6, %v341_v5  ;;  %v413_v11 = vld [vmem:[%s252_s15 + $0x1] sm:$0x1] (%p764_p3)  ;;  %412 = vst [vmem:[%s394_s7] sm:$0x1] (%p764_p3), %v411_v10 }
  0x4b   : > { %v415_v12 = vld [vmem:[%s252_s15 + $0x2] sm:$0x1] (%p764_p3)  ;;  %414 = vst [vmem:[%s394_s7 + $0x2] sm:$0x1] (%p764_p3), %v413_v11 }
  0x4c   : > { %v344_v8 = vrot.slane %v343_v7, 1  ;;  %392 = sbr.rel (!%p764_p3) target bundleno = 81 (0x51), region = 44  ;;  %v417_v13 = vld [vmem:[%s252_s15 + $0x3] sm:$0x1] (%p764_p3)  ;;  %416 = vst [vmem:[%s394_s7 + $0x4] sm:$0x1] (%p764_p3), %v415_v12 }
  0x4d   : > { %418 = vst [vmem:[%s394_s7 + $0x6] sm:$0x1] (%p764_p3), %v417_v13 }
  0x4e   : > { %v345_v9 = vadd.f32 %v344_v8, %v343_v7 }
  0x50   : > { %346 = vst [vmem:[%s271_s29] sm:$0x1] %v345_v9 }
  0x51 PF: > { %s16_s19 = sadd.s32 1, %s702_s19   ;;  %s847_s15 = smov %s690_s16 }
  0x52   : > { %p13_p12 = scmp.ge.s32.totalorder %s16_s19, 4   ;;  %s848_s16 = smov %s773_s25 }
  0x53   : > { %s849_s17 = smov %s698_s18  ;;  %s850_s18 = smov %s852_s21 }
  0x54   :  { %15 = sbr.rel (!%p13_p12) target bundleno = 3 (0x3), region = 122 }
  0x59   :  { %459 = vsyncpa [#allocation3], 1 }
  0x5a   :  { %461 = vsyncpa [#allocation3 + $0x1], 1 }

</bundles_post_ra>
